<compile_context>
chip_gen: v6e
topology: v6e:2x2x1
jax: 0.10.0
libtpu: 0.0.40
codegen_flags: <defaults>
</compile_context>

<pallas_src>
import numpy as np
import jax
import jax.numpy as jnp
from jax.experimental import pallas as pl
from jax.experimental.pallas import tpu as pltpu


def _ceil_to(x, m):
    return ((x + m - 1) // m) * m


# ----------------------------------------------------------------------------
# Kernel 1: 3x3 "same" conv + bias + ReLU as one im2col matmul per sample.
# Output layout [B, Cout, H*W]  ==  PyTorch NCHW flatten order, lane-dense.
# ----------------------------------------------------------------------------
def conv3x3_relu_kernel(p_ref, w_ref, b_ref, o_ref):
    # p_ref: [tb, Kc, HW]   im2col patches (contraction on sublanes, spatial on lanes)
    # w_ref: [Cout, Kc]     tap-major conv weight (zero-padded 27 -> Kc rows)
    # b_ref: [Cout, 1]
    # o_ref: [tb, Cout, HW] lane-dense, real channels only
    tb = p_ref.shape[0]
    for i in range(tb):  # tiny static unroll (tb <= 2); each dot result is 2 vregs
        y = jnp.dot(w_ref[...], p_ref[i], preferred_element_type=jnp.float32)
        o_ref[i] = jnp.maximum(y + b_ref[...], 0.0).astype(o_ref.dtype)


def conv3x3_relu(patches, w_r, b_r):
    """patches: [B, Kc, HW].  Returns [B, Cout, HW] (f32)."""
    B, Kc, HW = patches.shape
    Cout = w_r.shape[0]

    # >=2 grid steps per v7x TensorCore so double-buffering hides the patch DMA.
    if B % 4 == 0:
        G = 4
    elif B % 2 == 0:
        G = 2
    else:
        G = 1
    tb = B // G

    cost = pl.CostEstimate(
        flops=2 * B * HW * Kc * Cout,
        transcendentals=0,
        bytes_accessed=4 * (patches.size + w_r.size + b_r.size + B * Cout * HW),
    )
    return pl.pallas_call(
        conv3x3_relu_kernel,
        out_shape=jax.ShapeDtypeStruct((B, Cout, HW), jnp.float32),
        grid=(G,),
        in_specs=[
            pl.BlockSpec((tb, Kc, HW), lambda i: (i, 0, 0)),
            pl.BlockSpec((Cout, Kc), lambda i: (0, 0)),
            pl.BlockSpec((Cout, 1), lambda i: (0, 0)),
        ],
        out_specs=pl.BlockSpec((tb, Cout, HW), lambda i: (i, 0, 0)),
        compiler_params=pltpu.CompilerParams(
            dimension_semantics=("parallel",)),
        cost_estimate=cost,
    )(patches, w_r, b_r)


# ----------------------------------------------------------------------------
# Kernel 2: fused  Linear+ReLU (net_2) -> max over views -> Linear (net_3).
# One fully VMEM-resident step per object; grid is "parallel" over objects.
# ----------------------------------------------------------------------------
def fc_pool_cls_kernel(x_ref, w2t_ref, b2_ref, w3_ref, b3_ref, o_ref):
    # x_ref  : [1, V, K]     one object's views, K = Cout*H*W (real data only)
    # w2t_ref: [HID, K]      net_2 weight, transposed so K is lane-dense
    # b2_ref : [1, HID]
    # w3_ref : [HID, NCP]    net_3 weight, classes padded to 128 lanes
    # b3_ref : [1, NCP]
    # o_ref  : [1, 1, NCP]
    xv = x_ref[0]                                                  # [V, K]
    y2 = jax.lax.dot_general(xv, w2t_ref[...],
                             (((1,), (1,)), ((), ())),
                             preferred_element_type=jnp.float32)   # [V, HID]
    y2 = jnp.maximum(y2 + b2_ref[...], 0.0)
    pooled = jnp.max(y2, axis=0, keepdims=True)                    # [1, HID]
    out = jnp.dot(pooled, w3_ref[...],
                  preferred_element_type=jnp.float32) + b3_ref[...]
    o_ref[0] = out.astype(o_ref.dtype)


def fc_pool_classify(x3d, w2t, b2_r, w3_p, b3_p):
    """x3d: [nobj, V, K].  Returns [nobj, NCP] logits (padded classes)."""
    nobj, V, K = x3d.shape
    HID = w2t.shape[0]
    NCP = w3_p.shape[1]

    # Single-step FC: at K = Cout*H*W = 2048, HID = 32 the whole weight stream
    # is < 300 KiB, far below every generation's scoped-VMEM default, so K is
    # not tiled and there is no accumulator / pl.when init-finalize.
    # TODO(synk): for production fc sizes (e.g. K~25088, HID~4096) reinstate a
    # VMEM-aware K-tiled reduction grid (f32 accumulator + vmem_limit_bytes).
    fc_block_bytes = 4 * (V * K + HID * K + HID + HID * NCP + 2 * NCP)
    assert 2 * fc_block_bytes < 16 * 1024 * 1024, (
        "FC blocks exceed the conservative scoped-VMEM budget; re-enable K tiling")

    cost = pl.CostEstimate(
        flops=2 * nobj * V * K * HID + 2 * nobj * HID * NCP,
        transcendentals=0,
        bytes_accessed=4 * (x3d.size + w2t.size + b2_r.size + w3_p.size
                            + b3_p.size + nobj * NCP),
    )
    out = pl.pallas_call(
        fc_pool_cls_kernel,
        out_shape=jax.ShapeDtypeStruct((nobj, 1, NCP), jnp.float32),
        grid=(nobj,),
        in_specs=[
            pl.BlockSpec((1, V, K), lambda o: (o, 0, 0)),
            pl.BlockSpec((HID, K), lambda o: (0, 0)),
            pl.BlockSpec((1, HID), lambda o: (0, 0)),
            pl.BlockSpec((HID, NCP), lambda o: (0, 0)),
            pl.BlockSpec((1, NCP), lambda o: (0, 0)),
        ],
        out_specs=pl.BlockSpec((1, 1, NCP), lambda o: (o, 0, 0)),
        compiler_params=pltpu.CompilerParams(
            dimension_semantics=("parallel",)),
        cost_estimate=cost,
    )(x3d, w2t, b2_r, w3_p, b3_p)
    return out[:, 0, :]


# ----------------------------------------------------------------------------
# MVCNN forward (non-resnet branch)
# ----------------------------------------------------------------------------
def mvcnn_forward(x, params, num_views):
    B, Cin, H, W = x.shape
    w1, b1, w2, b2, w3, b3 = params
    Cout = w1.shape[0]
    HID = w2.shape[1]
    nclasses = w3.shape[1]
    HW = H * W
    K = Cout * HW

    assert B % num_views == 0
    nobj = B // num_views

    Kc = _ceil_to(9 * Cin, 8)       # im2col contraction depth, sublane-aligned
    NCP = _ceil_to(nclasses, 128)   # lane-dense classifier output padding

    # --- trace-time weight preprocessing (constant-folded under jit) ---
    # conv weight OIHW -> [Cout, (kh,kw,cin)] matching the patch flattening.
    w1_r = jnp.transpose(w1, (0, 2, 3, 1)).reshape(Cout, 9 * Cin)
    w1_r = jnp.pad(w1_r, ((0, 0), (0, Kc - 9 * Cin)))
    b1_r = b1.reshape(Cout, 1)
    # net_2 weight used unpermuted (conv output is already in NCHW flatten
    # order); stored transposed so the long K axis sits on lanes in VMEM.
    w2t = jnp.transpose(w2, (1, 0))                       # [HID, K]
    b2_r = b2.reshape(1, HID)
    w3_p = jnp.pad(w3, ((0, 0), (0, NCP - nclasses)))
    b3_p = jnp.pad(b3, (0, NCP - nclasses)).reshape(1, NCP)

    # --- input: NCHW -> lane-dense im2col patches [B, Kc, HW] (~200 KiB of
    # layout plumbing in the wrapper; spatial axis on lanes) ---
    xp = jnp.pad(x, ((0, 0), (0, 0), (1, 1), (1, 1)))
    taps = [xp[:, :, kh:kh + H, kw:kw + W]
            for kh in range(3) for kw in range(3)]
    patches = jnp.stack(taps, axis=1).reshape(B, 9 * Cin, HW)
    patches = jnp.pad(patches, ((0, 0), (0, Kc - 9 * Cin), (0, 0)))

    # --- net_1: Conv2d(3x3, pad=1) + ReLU (single Pallas kernel) ---
    y1 = conv3x3_relu(patches, w1_r, b1_r)                # [B, Cout, HW]

    # --- net_2 + view-pool + net_3 (single fused Pallas kernel) ---
    x3d = y1.reshape(nobj, num_views, K)                  # free row-major reshape
    logits = fc_pool_classify(x3d, w2t, b2_r, w3_p, b3_p)  # [nobj, NCP]
    return logits[:, :nclasses]


# Pure-JAX reference for correctness checking.
def mvcnn_reference(x, params, num_views):
    w1, b1, w2, b2, w3, b3 = params
    y1 = jax.lax.conv_general_dilated(
        x, w1, window_strides=(1, 1), padding="SAME",
        dimension_numbers=("NCHW", "OIHW", "NCHW"),
    ) + b1[None, :, None, None]
    y1 = jnp.maximum(y1, 0.0)
    y2 = jnp.maximum(y1.reshape(x.shape[0], -1) @ w2 + b2, 0.0)
    y2 = y2.reshape(x.shape[0] // num_views, num_views, -1)
    return jnp.max(y2, axis=1) @ w3 + b3


if __name__ == "__main__":
    # Small shapes consistent with the module: batch = n_objects * num_views,
    # 3-channel images, 40 classes.
    num_views = 4
    n_objects = 2
    B = n_objects * num_views          # 8
    Cin, H, W = 3, 16, 16
    C1 = 8                             # net_1 conv channels
    HID = 32                           # net_2 hidden dim
    nclasses = 40

    key = jax.random.PRNGKey(0)
    kx, k1, k2, k3, k4, k5, k6 = jax.random.split(key, 7)

    x = jax.random.normal(kx, (B, Cin, H, W), dtype=jnp.float32)

    w1 = 0.1 * jax.random.normal(k1, (C1, Cin, 3, 3), dtype=jnp.float32)
    b1 = 0.1 * jax.random.normal(k2, (C1,), dtype=jnp.float32)
    w2 = 0.05 * jax.random.normal(k3, (C1 * H * W, HID), dtype=jnp.float32)
    b2 = 0.05 * jax.random.normal(k4, (HID,), dtype=jnp.float32)
    w3 = 0.1 * jax.random.normal(k5, (HID, nclasses), dtype=jnp.float32)
    b3 = 0.1 * jax.random.normal(k6, (nclasses,), dtype=jnp.float32)
    params = (w1, b1, w2, b2, w3, b3)

    out = mvcnn_forward(x, params, num_views)
    out = jax.block_until_ready(out)

    ref = jax.block_until_ready(mvcnn_reference(x, params, num_views))
    assert out.shape == (n_objects, nclasses)
    np.testing.assert_allclose(np.asarray(out), np.asarray(ref),
                               rtol=1e-3, atol=1e-3)

    print("KERNEL_OK")
</pallas_src>

<mosaic_0001>
module attributes {stable_mosaic.version = 11 : i64} {
  func.func @conv3x3_relu_kernel(%arg0: i32, %arg1: memref<2x32x256xf32, #tpu.memory_space<vmem>>, %arg2: memref<8x32xf32, #tpu.memory_space<vmem>>, %arg3: memref<8x1xf32, #tpu.memory_space<vmem>>, %arg4: memref<2x8x256xf32, #tpu.memory_space<vmem>>) attributes {dimension_semantics = [#tpu.dimension_semantics<parallel>], iteration_bounds = array<i64: 4>, scalar_prefetch = 0 : i64, scratch_operands = 0 : i64, tpu.core_type = #tpu.core_type<tc>, window_params = [{transform_indices = @transform_0, window_bounds = array<i64: 2, 32, 256>}, {pipeline_mode = #tpu.pipeline_mode<synchronous>, transform_indices = @transform_1, window_bounds = array<i64: 8, 32>}, {pipeline_mode = #tpu.pipeline_mode<synchronous>, transform_indices = @transform_2, window_bounds = array<i64: 8, 1>}, {transform_indices = @transform_3, window_bounds = array<i64: 2, 8, 256>}]} {
    %c0 = arith.constant 0 : index
    %c0_0 = arith.constant 0 : index
    %0 = vector.load %arg2[%c0, %c0_0] : memref<8x32xf32, #tpu.memory_space<vmem>>, vector<8x32xf32>
    %c0_1 = arith.constant 0 : index
    %c0_2 = arith.constant 0 : index
    %c0_3 = arith.constant 0 : index
    %1 = vector.load %arg1[%c0_1, %c0_2, %c0_3] : memref<2x32x256xf32, #tpu.memory_space<vmem>>, vector<1x32x256xf32>
    %2 = vector.shape_cast %1 : vector<1x32x256xf32> to vector<32x256xf32>
    %cst = arith.constant dense<0.000000e+00> : vector<8x256xf32>
    %3 = tpu.matmul %0, %2, %cst {dimension_numbers = #tpu.dot_dimension_numbers<[1], [0], [0], [1], [0, 0, 1, 1], [], []>} : vector<8x32xf32>, vector<32x256xf32>, vector<8x256xf32> -> vector<8x256xf32>
    %c0_4 = arith.constant 0 : index
    %c0_5 = arith.constant 0 : index
    %4 = vector.load %arg3[%c0_4, %c0_5] : memref<8x1xf32, #tpu.memory_space<vmem>>, vector<8x1xf32>
    %5 = vector.broadcast %4 : vector<8x1xf32> to vector<8x256xf32>
    %6 = arith.addf %3, %5 : vector<8x256xf32>
    %cst_6 = arith.constant 0.000000e+00 : f32
    %7 = vector.broadcast %cst_6 : f32 to vector<8x256xf32>
    %8 = arith.maximumf %6, %7 : vector<8x256xf32>
    %c0_7 = arith.constant 0 : index
    %c0_8 = arith.constant 0 : index
    %c0_9 = arith.constant 0 : index
    %9 = vector.load %arg4[%c0_7, %c0_8, %c0_9] : memref<2x8x256xf32, #tpu.memory_space<vmem>>, vector<1x8x256xf32>
    %10 = vector.shape_cast %9 : vector<1x8x256xf32> to vector<8x256xf32>
    %11 = vector.shape_cast %8 : vector<8x256xf32> to vector<1x8x256xf32>
    tpu.vector_store %arg4[%c0_7, %c0_8, %c0_9], %11 {strides = array<i32>} : memref<2x8x256xf32, #tpu.memory_space<vmem>>, vector<1x8x256xf32>,
    %c0_10 = arith.constant 0 : index
    %c0_11 = arith.constant 0 : index
    %12 = vector.load %arg2[%c0_10, %c0_11] : memref<8x32xf32, #tpu.memory_space<vmem>>, vector<8x32xf32>
    %c1 = arith.constant 1 : index
    %c0_12 = arith.constant 0 : index
    %c0_13 = arith.constant 0 : index
    %13 = vector.load %arg1[%c1, %c0_12, %c0_13] : memref<2x32x256xf32, #tpu.memory_space<vmem>>, vector<1x32x256xf32>
    %14 = vector.shape_cast %13 : vector<1x32x256xf32> to vector<32x256xf32>
    %cst_14 = arith.constant dense<0.000000e+00> : vector<8x256xf32>
    %15 = tpu.matmul %12, %14, %cst_14 {dimension_numbers = #tpu.dot_dimension_numbers<[1], [0], [0], [1], [0, 0, 1, 1], [], []>} : vector<8x32xf32>, vector<32x256xf32>, vector<8x256xf32> -> vector<8x256xf32>
    %c0_15 = arith.constant 0 : index
    %c0_16 = arith.constant 0 : index
    %16 = vector.load %arg3[%c0_15, %c0_16] : memref<8x1xf32, #tpu.memory_space<vmem>>, vector<8x1xf32>
    %17 = vector.broadcast %16 : vector<8x1xf32> to vector<8x256xf32>
    %18 = arith.addf %15, %17 : vector<8x256xf32>
    %cst_17 = arith.constant 0.000000e+00 : f32
    %19 = vector.broadcast %cst_17 : f32 to vector<8x256xf32>
    %20 = arith.maximumf %18, %19 : vector<8x256xf32>
    %c1_18 = arith.constant 1 : index
    %c0_19 = arith.constant 0 : index
    %c0_20 = arith.constant 0 : index
    %21 = vector.load %arg4[%c1_18, %c0_19, %c0_20] : memref<2x8x256xf32, #tpu.memory_space<vmem>>, vector<1x8x256xf32>
    %22 = vector.shape_cast %21 : vector<1x8x256xf32> to vector<8x256xf32>
    %23 = vector.shape_cast %20 : vector<8x256xf32> to vector<1x8x256xf32>
    tpu.vector_store %arg4[%c1_18, %c0_19, %c0_20], %23 {strides = array<i32>} : memref<2x8x256xf32, #tpu.memory_space<vmem>>, vector<1x8x256xf32>,
    return
  }
  func.func @transform_0(%arg0: i32) -> (i32, i32, i32) {
    %c0_i32 = arith.constant 0 : i32
    %c0_i32_0 = arith.constant 0 : i32
    %c0_i32_1 = arith.constant 0 : i32
    return %arg0, %c0_i32, %c0_i32_0 : i32, i32, i32
  }
  func.func @transform_1(%arg0: i32) -> (i32, i32) {
    %c0_i32 = arith.constant 0 : i32
    %c0_i32_0 = arith.constant 0 : i32
    %c0_i32_1 = arith.constant 0 : i32
    return %c0_i32, %c0_i32_0 : i32, i32
  }
  func.func @transform_2(%arg0: i32) -> (i32, i32) {
    %c0_i32 = arith.constant 0 : i32
    %c0_i32_0 = arith.constant 0 : i32
    %c0_i32_1 = arith.constant 0 : i32
    return %c0_i32, %c0_i32_0 : i32, i32
  }
  func.func @transform_3(%arg0: i32) -> (i32, i32, i32) {
    %c0_i32 = arith.constant 0 : i32
    %c0_i32_0 = arith.constant 0 : i32
    %c0_i32_1 = arith.constant 0 : i32
    return %arg0, %c0_i32, %c0_i32_0 : i32, i32, i32
  }
}

</mosaic_0001>

<bundles_post_ra>
// kernel: tpu_custom_call.1
= control target key start
LH: loop header
LB: loop body
LE: loop exit
PB: predicated region body
PF: predicated region fallthrough
CT: control target
= control target key end

     0   :  { %8 = vsyncpa [#allocation3], 0  ;;  %s853_s0 = inlined_call_operand.hbm [shape: f32[8,32,256], index: 0, kind: input, shape index: {}]   ;;  %s854_s1 = inlined_call_operand.vmem [shape: f32[8,32], index: 1, kind: input, shape index: {}]   ;;  %s855_s2 = inlined_call_operand.vmem [shape: f32[8,1], index: 2, kind: input, shape index: {}]   ;;  %s856_s3 = inlined_call_operand.hbm [shape: f32[8,8,256], index: 3, kind: output, shape index: {}]  }
   0x1   :  { %10 = vsyncpa [#allocation3 + $0x1], 0 }
   0x2   :  { %11 = vsyncpa [#allocation4], 0 }
   0x3   :  { %13 = vsyncpa [#allocation4 + $0x1], 0  ;;  %s676_s12 = smov 0   ;;  %s678_s13 = smov 0  }
   0x4   :  { %s680_s14 = smov 0   ;;  %s682_s15 = smov 0  }
   0x5 LB: > { %s697_s16 = sadd.s32 4294967295, %s646_s15   ;;  %s469_s17 = sadd.s32 4294967294, %s646_s15   ;;  %s646_s15 = sphi %s682_s15, %s870_s15   ;;  %s642_s14 = sphi %s680_s14, %s869_s14   ;;  %s638_s13 = sphi %s678_s13, %s868_s13   ;;  %s634_s12 = sphi %s676_s12, %s867_s12  }
   0x6   : > { %s701_s18 = sadd.s32 1, %s646_s15   ;;  %s26_s19 = sadd.s32 1, %s642_s14 }
   0x7   : > { %s23_s20 = ssub.s32 %s646_s15, %s701_s18  ;;  %p33_p0 = scmp.ne.s32.totalorder %s642_s14, %s638_s13 }
   0x8   : > { %p24_p1 = scmp.eq.s32.totalorder %s23_s20, 0  ;;  %p34_p2 = scmp.eq.s32.totalorder %s646_s15, 0 }
   0x9   : > { %p39_p3 = scmp.ne.s32.totalorder %s638_s13, %s634_s12  ;;  %p40_p4 = scmp.eq.s32.totalorder %s697_s16, 0 }
   0xa   : > { %s713_s21 = scalar_select %p24_p1, %s642_s14, %s26_s19  }
   0xb   : > { %p715_p5 = por %p34_p2, %p33_p0  ;;  %p719_p6 = por %p40_p4, %p39_p3 }
   0xc   : > { %p105_p7 = scmp.eq.s32.totalorder %s697_s16, 3  ;;  %p111_p8 = scmp.eq.s32.totalorder %s469_s17, 3 }
   0xd   : > { %s860_s23 = scalar_select %p719_p6, 1, 0 }
   0xe   : > { %p513_p9 = scmp.lt.s32.totalorder %s646_s15, 4  ;;  %p725_p10 = por %p105_p7, %p33_p0 }
   0xf   : > { %p729_p11 = por %p111_p8, %p39_p3  ;;  %s137_s26 = sand.u32 1, %s642_s14  }
  0x10   : > { %s861_s24 = scalar_select %p725_p10, 1, 0 }
  0x11   : > { %s862_s25 = scalar_select %p729_p11, 1, 0 }
  0x12   : > { %s498_s27 = sshll.u32 %s646_s15, 11  ;;  %s472_s28 = sshll.u32 %s137_s26, 7 }
  0x13   : > { %s738_s4 = scalar_lea.hbm %s853_s0, %s498_s27  ;;  %s141_s5 = scalar_lea.vmem [#allocation2], %s472_s28 }
  0x14   : > { %s149_s6 = sshll.u32 %s141_s5, 4  ;;  %p742_p12 = pnand %p513_p9, %p715_p5  ;;  %s746_s6 = int_to_ptr.vmem [resolvable:$true] %s149_s6 }
  0x15   : > { %s748_s8 = scalar_lea.sflag [#allocation3], %s137_s26  ;;  %s554_s9 = scalar_lea.hbm %s738_s4, 2048 }
  0x16   : > { %p555_p13 = scmp.ne.s32.totalorder %s738_s4, %s554_s9  ;;  %p556_p0 = pneg %p742_p12 }
  0x17   : > { %s559_s17 = scalar_lea.hbm %s853_s0, 8192  ;;  %p560_p3 = scmp.lt.s32.totalorder %s738_s4, %s853_s0 }
  0x18   : > { %p557_p1 = pnand %p556_p0, %p555_p13  ;;  %p561_p4 = scmp.lt.s32.totalorder %s559_s17, %s554_s9 }
  0x1a   : > { %p558_p2 = pneg %p557_p1  ;;  %p562_p5 = por %p561_p4, %p560_p3 }
  0x1c   : > { %p563_p7 = pnand %p562_p5, %p558_p2 }
  0x1e   : > { %566 = shalt.err (!%p563_p7)
}
  0x1f   : > { %s567_s22 = scalar_lea.vmem %s746_s6, 2048  ;;  %s648_s26 = smov [#allocation2]  }
  0x20   : > { %p568_p8 = scmp.ne.s32.totalorder %s746_s6, %s567_s22  ;;  %s572_s27 = sshll.u32 %s648_s26, 4  ;;  %s573_s27 = int_to_ptr.vmem [resolvable:$false] %s572_s27 }
  0x21   : > { %s574_s28 = scalar_lea.vmem %s573_s27, 4096  ;;  %p575_p1 = scmp.lt.s32.totalorder %s746_s6, %s573_s27 }
  0x22   : > { %p570_p9 = pnand %p568_p8, %p556_p0  ;;  %p576_p11 = scmp.lt.s32.totalorder %s574_s28, %s567_s22 }
  0x24   : > { %p571_p13 = pneg %p570_p9  ;;  %p577_p10 = por %p576_p11, %p575_p1 }
  0x26   : > { %p578_p6 = pnand %p577_p10, %p571_p13 }
  0x28   : > { %581 = shalt.err (!%p578_p6)
}
  0x29   : > { %s649_s29 = smov 256   ;;  %s650_s30 = smov 16  }
  0x2a   : > { %508 = dma.hbm_to_vmem [thread:$0]  (!%p742_p12), %s738_s4, 2048, %s746_s6, %s748_s8, %s649_s29, %s649_s29, %s650_s30  }
  0x2b   : > { %p476_p0 = scmp.ge.s32.totalorder %s646_s15, 1  ;;  %p157_p2 = scmp.lt.s32.totalorder %s646_s15, 5 }
  0x2d   : > { %p158_p3 = pnand %p476_p0, %p157_p2 }
  0x2e   : > { %s772_s5 = sand.u32 (!%p158_p3), 1, %s638_s13   ;;  %p864_p6 = scmp.ne.s32.totalorder (!%p158_p3), %s860_s23, 0 }
  0x2f   : > { %161 = sbr.rel (%p158_p3) target bundleno = 277 (0x115), region = 32  ;;  %s477_s9 = sshll.u32 (!%p158_p3), %s772_s5, 7 }
  0x30   : > { %s164_s10 = scalar_lea.sflag (!%p158_p3), [#allocation3], %s772_s5  ;;  %s776_s11 = scalar_lea.vmem (!%p158_p3), [#allocation2], %s477_s9 }
  0x34   : > { %625 = dma.done.wait (%p864_p6), %s164_s10, 2048  }
  0x35   : > { %627 = vsyncadd (%p864_p6), %s164_s10, 4294965248  ;;  %v651_v0 = vmov 0.0   ;;  %v652_v1 = vmov 0   ;;  %v200_v2 = vld [vmem:[%s776_s11 + $0x38] sm:$0xff]  ;;  %v199_v4 = vld [vmem:[%s776_s11 + $0x30] sm:$0xff]  ;;  %vm207_vm0 = vcmask 261120  }
  0x36   : > { %275 = vmatprep.mubr.f32.mxu0 %v651_v0  ;;  %369 = vmatprep.mubr.f32.mxu1 %v651_v0  ;;  %v487_v3 = vld [vmem:[%s776_s11 + $0x78] sm:$0xff]  ;;  %v486_v5 = vld [vmem:[%s776_s11 + $0x70] sm:$0xff]  ;;  %v198_v6 = vld [vmem:[%s776_s11 + $0x28] sm:$0xff]  ;;  %s478_s8 = sshll.u32 %s772_s5, 5  ;;  %s500_s20 = sshll.u32 %s697_s16, 9 }
  0x37   : > { %553 = vset.pattern.permute.xlu0 %v652_v1  ;;  %235 = vmatprep.subr.mxu0 %v200_v2  ;;  %v485_v7 = vld [vmem:[%s776_s11 + $0x68] sm:$0xff]  ;;  %v197_v8 = vld [vmem:[%s776_s11 + $0x20] sm:$0xff]  ;;  %v196_v10 = vld [vmem:[%s776_s11 + $0x18] sm:$0xff]  ;;  %s189_s17 = scalar_lea.vmem [#allocation5], %s478_s8  ;;  %s811_s27 = scalar_lea.hbm %s856_s3, %s500_s20 }
  0x38   : > { %329 = vmatprep.subr.mxu1 %v487_v3  ;;  %236 = vmatpush1.msra.mxu0 %v199_v4  ;;  %v484_v9 = vld [vmem:[%s776_s11 + $0x60] sm:$0xff]  ;;  %v483_v11 = vld [vmem:[%s776_s11 + $0x58] sm:$0xff]  ;;  %v195_v12 = vld [vmem:[%s776_s11 + $0x10] sm:$0xff]  ;;  %s396_s19 = sshll.u32 %s189_s17, 4  ;;  %s382_s16 = scalar_lea.sflag [#allocation4], %s772_s5  ;;  %s806_s19 = int_to_ptr.vmem [resolvable:$true] %s396_s19 }
  0x39   : > { %330 = vmatpush1.msra.mxu1 %v486_v5  ;;  %237 = vmatprep.subr.mxu0 %v198_v6  ;;  %v482_v13 = vld [vmem:[%s776_s11 + $0x50] sm:$0xff]  ;;  %v194_v14 = vld [vmem:[%s776_s11 + $0x8] sm:$0xff]  ;;  %v193_v16 = vld [vmem:[%s776_s11] sm:$0xff]  ;;  %s582_s28 = scalar_lea.vmem %s806_s19, 512  ;;  %p865_p11 = scmp.ne.s32.totalorder %s861_s24, 0 }
  0x3a   : > { %331 = vmatprep.subr.mxu1 %v485_v7  ;;  %238 = vmatpush1.msra.mxu0 %v197_v8  ;;  %v481_v15 = vld [vmem:[%s776_s11 + $0x48] sm:$0xff]  ;;  %v480_v17 = vld [vmem:[%s776_s11 + $0x40] sm:$0xff]  ;;  %p583_p10 = scmp.ne.s32.totalorder %s806_s19, %s582_s28  ;;  %s653_s29 = smov [#allocation5]  }
  0x3b   : > { %332 = vmatpush1.msra.mxu1 %v484_v9  ;;  %239 = vmatprep.subr.mxu0 %v196_v10  ;;  %v192_v18 = vld [vmem:[%s854_s1] sm:$0xff]  ;;  %s586_s30 = sshll.u32 %s653_s29, 4  ;;  %s587_s30 = int_to_ptr.vmem [resolvable:$false] %s586_s30 }
  0x3c   : > { %333 = vmatprep.subr.mxu1 %v483_v11  ;;  %240 = vmatpush1.msra.mxu0 %v195_v12  ;;  %v201_v19 = vld [vmem:[%s855_s2] sm:$0xff]  ;;  %p584_p12 = pnand %p583_p10, %p865_p11  ;;  %s588_s9 = scalar_lea.vmem %s587_s30, 1024 }
  0x3d   : > { %334 = vmatpush1.msra.mxu1 %v482_v13  ;;  %241 = vmatprep.subr.mxu0 %v194_v14  ;;  %p589_p5 = scmp.lt.s32.totalorder %s806_s19, %s587_s30  ;;  %p590_p7 = scmp.lt.s32.totalorder %s588_s9, %s582_s28 }
  0x3e   : > { %335 = vmatprep.subr.mxu1 %v481_v15  ;;  %242 = vmatpush1.msra.mxu0 %v193_v16  ;;  %p585_p4 = pneg %p584_p12 }
  0x3f   : > { %336 = vmatpush1.msra.mxu1 %v480_v17  ;;  %479 = vmatmul.mubr.msk.f32.vlgmr.msra.gmra.mxu0 %vm207_vm0, %v192_v18  ;;  %p591_p8 = por %p590_p7, %p589_p5 }
  0x40   : > { %488 = vmatmul.mubr.msk.f32.vlgmr.msra.gmra.mxu1 %vm207_vm0, %v192_v18  ;;  %204 = vperm.xlu0 %553, %v201_v19  }
  0x41   : > { %p592_p9 = pnand %p591_p8, %p585_p4 }
  0x44   : > { %299 = vperm.xlu0 %553, %v201_v19  }
  0xbb   : > { %v205_v20 = vpop.permute.xlu0 %204 }
  0xbf   : > { %v300_v21 = vpop.permute.xlu0 %299 }
  0xff   : > { %v277_v22 = vpop.f32.mrf.mxu0 }
 0x100   : > { %v371_v23 = vpop.f32.mrf.mxu1  ;;  %v278_v24 = vadd.f32 %v277_v22, %v205_v20 }
 0x101   : > { %v372_v25 = vadd.f32 %v371_v23, %v300_v21  ;;  %v279_v26 = vpop.f32.mrf.mxu0 }
 0x102   : > { %v373_v27 = vpop.f32.mrf.mxu1  ;;  %v282_v28 = vmax.f32 %v278_v24, 0.0  ;;  %v280_v30 = vadd.f32 %v279_v26, %v205_v20 }
 0x103   : > { %v376_v29 = vmax.f32 %v372_v25, 0.0  ;;  %v374_v31 = vadd.f32 %v373_v27, %v300_v21 }
 0x104   : > { %284 = vst [vmem:[%s189_s17] sm:$0xff] %v282_v28  ;;  %v283_v32 = vmax.f32 %v280_v30, 0.0 }
 0x105   : > { %489 = vst [vmem:[%s189_s17 + $0x10] sm:$0xff] %v376_v29  ;;  %v377_v33 = vmax.f32 %v374_v31, 0.0 }
 0x106   : > { %285 = vst [vmem:[%s189_s17 + $0x8] sm:$0xff] %v283_v32 }
 0x107   : > { %490 = vst [vmem:[%s189_s17 + $0x18] sm:$0xff] %v377_v33 }
 0x108   : > { %595 = shalt.err (!%p592_p9)
}
 0x109   : > { %s596_s10 = scalar_lea.hbm %s811_s27, 512  ;;  %s600_s4 = scalar_lea.hbm %s856_s3, 2048 }
 0x10a   : > { %p597_p13 = scmp.ne.s32.totalorder %s811_s27, %s596_s10  ;;  %p601_p2 = scmp.lt.s32.totalorder %s811_s27, %s856_s3 }
 0x10b   : > { %p602_p3 = scmp.lt.s32.totalorder %s600_s4, %s596_s10 }
 0x10c   : > { %p598_p1 = pnand %p597_p13, %p865_p11 }
 0x10d   : > { %p603_p6 = por %p602_p3, %p601_p2 }
 0x10e   : > { %p599_p0 = pneg %p598_p1 }
 0x110   : > { %p604_p10 = pnand %p603_p6, %p599_p0 }
 0x112   : > { %607 = shalt.err (!%p604_p10)
}
 0x113   : > { %s654_s8 = smov 256   ;;  %s655_s17 = smov 16  }
 0x114   : > { %503 = dma.vmem_to_hbm [thread:$0]  (%p865_p11), %s806_s19, 512, %s811_s27, %s382_s16, %s654_s8, %s654_s8, %s655_s17  }
 0x115 PF: > { %p514_p12 = scmp.ge.s32.totalorder %s646_s15, 2  ;;  %s411_s20 = sand.u32 1, %s634_s12  }
 0x116   : > { %p866_p4 = scmp.ne.s32.totalorder %s862_s25, 0  ;;  %s412_s22 = scalar_lea.sflag [#allocation4], %s411_s20 }
 0x118   : > { %p510_p5 = pnand %p514_p12, %p866_p4 }
 0x11a   : > { %p511_p7 = pneg %p510_p5 }
 0x11c   : > { %629 = dma.done.wait (%p511_p7), %s412_s22, 512  }
 0x11d   : > { %631 = vsyncadd (%p511_p7), %s412_s22, 4294966784  ;;  %p16_p8 = scmp.ge.s32.totalorder %s701_s18, 6   ;;  %s867_s12 = smov %s638_s13 }
 0x11e   : > { %s868_s13 = smov %s642_s14  ;;  %s869_s14 = smov %s713_s21 }
 0x11f   : > { %s870_s15 = smov %s701_s18  ;;  %18 = sbr.rel (!%p16_p8) target bundleno = 5 (0x5), region = 79 }
 0x124   :  { %417 = vsyncpa [#allocation3], 1 }
 0x125   :  { %419 = vsyncpa [#allocation3 + $0x1], 1 }
 0x126   :  { %420 = vsyncpa [#allocation4], 1 }
 0x127   :  { %422 = vsyncpa [#allocation4 + $0x1], 1 }

</bundles_post_ra>
